<compile_context>
chip_gen: v5e
topology: v5e:2x2
jax: 0.10.0
libtpu: 0.0.40
codegen_flags: <defaults>
</compile_context>

<pallas_src>
import jax
import jax.numpy as jnp
from jax.experimental import pallas as pl
from jax.experimental.pallas import tpu as pltpu


_LANE = 128
_TARGET_TILE_BYTES = 8 * 1024 * 1024    # ~8 MiB for the wider VMEM block per grid step
_VMEM_LIMIT_CAP = 48 * 1024 * 1024      # safe on v7x (64 MiB physical VMEM)


def _round_up(x: int, m: int) -> int:
    return ((x + m - 1) // m) * m


def _chomp_kernel(x_ref, o_ref):
    l_out = o_ref.shape[-1]
    if l_out == x_ref.shape[-1]:
        # Column-tiled path: blocks have identical shape -> unmasked whole-block copy.
        o_ref[...] = x_ref[...]
    else:
        # Narrow path: input block is wider than the output; static prefix slice.
        o_ref[...] = x_ref[:, :l_out]


def chomp1d(x: jax.Array, chomp_size: int) -> jax.Array:
    """Pallas equivalent of Chomp1d.forward: x[:, :, :-chomp_size]."""
    assert x.ndim == 3, "expected (N, C, L)"
    assert chomp_size >= 0
    n, c, l = x.shape
    l_out = l - chomp_size

    if chomp_size == 0 or l_out <= 0:
        # PyTorch parity: x[:, :, :-0] and x[:, :, :-k] with k >= L are empty slices.
        return jnp.empty((n, c, 0), dtype=x.dtype)

    # Flatten (N, C) into one row axis: the chomp is a per-row prefix copy.
    r = n * c
    x2 = x.reshape(r, l)

    itemsize = jnp.dtype(x.dtype).itemsize
    sublane = max(8, 32 // itemsize)          # 8 for f32, 16 for bf16, 32 for int8/fp8
    budget_elems = _TARGET_TILE_BYTES // itemsize

    def pick_tr(cols: int) -> int:
        """Rows per tile: multiple of the sublane count, sized to the byte budget,
        and split so the parallel row axis has >= 2 steps when possible (v7x 2 TCs)."""
        tr = max(sublane, (budget_elems // max(cols, 1)) // sublane * sublane)
        tr = min(tr, _round_up(r, sublane))
        if pl.cdiv(r, tr) < 2 and r > sublane:
            tr = _round_up(pl.cdiv(r, 2), sublane)
        return tr

    if l_out >= _LANE:
        # Lane-dense column-tiled path: tiles are multiples of 128 lanes, and the
        # chomped tail beyond round_up(L_out, 128) is never DMA'd.
        l_out_pad = _round_up(l_out, _LANE)
        max_tc = 2048
        if l_out_pad <= max_tc:
            tc = l_out_pad                                     # single column tile
        else:
            n_col0 = pl.cdiv(l_out_pad, max_tc)
            tc = _round_up(pl.cdiv(l_out_pad, n_col0), _LANE)  # balanced tiles
        n_col = pl.cdiv(l_out, tc)
        tr = pick_tr(tc)
        in_cols, out_cols = tc, tc

        if n_col == 1:
            grid = (pl.cdiv(r, tr),)
            in_specs = [pl.BlockSpec((tr, tc), lambda i: (i, 0))]
            out_specs = pl.BlockSpec((tr, tc), lambda i: (i, 0))
            dims = ("parallel",)
        else:
            grid = (pl.cdiv(r, tr), n_col)
            in_specs = [pl.BlockSpec((tr, tc), lambda i, j: (i, j))]
            out_specs = pl.BlockSpec((tr, tc), lambda i, j: (i, j))
            dims = ("parallel", "parallel")
    else:
        # Narrow fallback (L_out < 128): one output column block of the full width;
        # read at most the first 128 input columns (skip the chomped tail when L >= 128)
        # and grow the row tile to the byte budget.
        cb = _LANE if l >= _LANE else l
        tr = pick_tr(cb)
        in_cols, out_cols = cb, l_out
        grid = (pl.cdiv(r, tr),)
        in_specs = [pl.BlockSpec((tr, cb), lambda i: (i, 0))]
        out_specs = pl.BlockSpec((tr, l_out), lambda i: (i, 0))
        dims = ("parallel",)

    # Double-buffered in+out footprint plus headroom: above v5e's 16 MiB default
    # scoped VMEM, below v7x's 64 MiB physical VMEM.
    footprint = 2 * tr * (in_cols + out_cols) * itemsize
    vmem_limit = min(_VMEM_LIMIT_CAP,
                     max(32 * 1024 * 1024, footprint + 8 * 1024 * 1024))

    out2 = pl.pallas_call(
        _chomp_kernel,
        out_shape=jax.ShapeDtypeStruct((r, l_out), x.dtype),
        grid=grid,
        in_specs=in_specs,
        out_specs=out_specs,
        compiler_params=pltpu.CompilerParams(
            dimension_semantics=dims,
            vmem_limit_bytes=vmem_limit,
        ),
    )(x2)

    return out2.reshape(n, c, l_out)


if __name__ == "__main__":
    key = jax.random.PRNGKey(0)
    k1, k2, k3, k4 = jax.random.split(key, 4)

    # 1) Small TCN-like shape: batch=2, channels=4, length=16, chomp=3.
    #    Narrow path with L < 128.
    x1 = jax.random.normal(k1, (2, 4, 16), dtype=jnp.float32)
    out1 = jax.block_until_ready(chomp1d(x1, 3))
    ref1 = x1[:, :, :-3]
    assert out1.shape == ref1.shape == (2, 4, 13)
    assert jnp.array_equal(out1, ref1)

    # 2) Lane-dense path where the padded column tile (round_up(379,128)=512)
    #    extends past L=384: exercises partial-edge-block reads + masked stores.
    x2 = jax.random.normal(k2, (2, 8, 384), dtype=jnp.float32)
    out2 = jax.block_until_ready(chomp1d(x2, 5))
    ref2 = x2[:, :, :-5]
    assert out2.shape == ref2.shape == (2, 8, 379)
    assert jnp.array_equal(out2, ref2)

    # 3) Narrow path with L >= 128: input block reads only the first 128 columns,
    #    the large chomped tail is never DMA'd.
    x3 = jax.random.normal(k3, (2, 4, 200), dtype=jnp.float32)
    out3 = jax.block_until_ready(chomp1d(x3, 150))
    ref3 = x3[:, :, :-150]
    assert out3.shape == ref3.shape == (2, 4, 50)
    assert jnp.array_equal(out3, ref3)

    # 4) bf16 (packed sublanes): lane-dense single-column-tile path.
    x4 = jax.random.normal(k4, (2, 4, 300), dtype=jnp.float32).astype(jnp.bfloat16)
    out4 = jax.block_until_ready(chomp1d(x4, 44))
    ref4 = x4[:, :, :-44]
    assert out4.shape == ref4.shape == (2, 4, 256)
    assert jnp.array_equal(out4, ref4)

    print("KERNEL_OK")
</pallas_src>

<mosaic_0001>
module attributes {stable_mosaic.version = 11 : i64} {
  func.func @_chomp_kernel(%arg0: i32, %arg1: memref<8x16xf32, #tpu.memory_space<vmem>>, %arg2: memref<8x13xf32, #tpu.memory_space<vmem>>) attributes {dimension_semantics = [#tpu.dimension_semantics<parallel>], iteration_bounds = array<i64: 1>, scalar_prefetch = 0 : i64, scratch_operands = 0 : i64, tpu.core_type = #tpu.core_type<tc>, window_params = [{transform_indices = @transform_0, window_bounds = array<i64: 8, 16>}, {transform_indices = @transform_1, window_bounds = array<i64: 8, 13>}]} {
    %c0 = arith.constant 0 : index
    %c0_0 = arith.constant 0 : index
    %0 = vector.load %arg1[%c0, %c0_0] : memref<8x16xf32, #tpu.memory_space<vmem>>, vector<8x13xf32>
    %c0_1 = arith.constant 0 : index
    %c0_2 = arith.constant 0 : index
    %1 = vector.load %arg2[%c0_1, %c0_2] : memref<8x13xf32, #tpu.memory_space<vmem>>, vector<8x13xf32>
    tpu.vector_store %arg2[%c0_1, %c0_2], %0 {strides = array<i32>} : memref<8x13xf32, #tpu.memory_space<vmem>>, vector<8x13xf32>,
    return
  }
  func.func @transform_0(%arg0: i32) -> (i32, i32) {
    %c0_i32 = arith.constant 0 : i32
    %c0_i32_0 = arith.constant 0 : i32
    return %arg0, %c0_i32 : i32, i32
  }
  func.func @transform_1(%arg0: i32) -> (i32, i32) {
    %c0_i32 = arith.constant 0 : i32
    %c0_i32_0 = arith.constant 0 : i32
    return %arg0, %c0_i32 : i32, i32
  }
}

</mosaic_0001>

<bundles_post_ra>
// kernel: tpu_custom_call.1
= control target key start
LH: loop header
LB: loop body
LE: loop exit
PB: predicated region body
PF: predicated region fallthrough
CT: control target
= control target key end

     0   :  { %6 = vsyncpa [#allocation3], 0  ;;  %s115_s0 = inlined_call_operand.hbm [shape: f32[8,16], index: 0, kind: input, shape index: {}]   ;;  %s116_s1 = inlined_call_operand.hbm [shape: f32[8,13], index: 1, kind: output, shape index: {}]  }
   0x1   :  { %7 = vsyncpa [#allocation4], 0  ;;  %s13_s8 = sshll.u32 %s115_s0, 4  ;;  %s97_s9 = smov [#allocation2]   ;;  %s14_s8 = int_to_ptr.hbm [resolvable:$true] %s13_s8 }
   0x2   :  { %s15_s10 = sshll.u32 %s97_s9, 4  ;;  %s16_s10 = int_to_ptr.vmem [resolvable:$true] %s15_s10 }
   0x3   :  { %18 = dma.hbm_to_vmem [thread:$0]  %s14_s8, 128, %s16_s10, [#allocation3]  }
   0x4   :  { %93 = dma.done.wait [#allocation3], 128  }
   0x5   :  { %94 = vsyncadd [#allocation3], 4294967168  ;;  %s98_s11 = smov [#allocation5]   ;;  %s33_s15 = sshll.u32 %s116_s1, 4  ;;  %vm24_vm0 = vcmask 105472   ;;  %v23_v0 = vld [vmem:[#allocation2] sm:$0xff]  ;;  %s34_s15 = int_to_ptr.hbm [resolvable:$true] %s33_s15 }
   0x6   :  { %s31_s12 = sshll.u32 %s98_s11, 4  ;;  %25 = vst.msk [vmem:[#allocation5] sm:$0xff] %vm24_vm0, %v23_v0  ;;  %s32_s12 = int_to_ptr.vmem [resolvable:$true] %s31_s12 }
   0x7   :  { %36 = dma.vmem_to_hbm [thread:$0]  %s32_s12, 128, %s34_s15, [#allocation4]  }
   0x8   :  { %95 = dma.done.wait [#allocation4], 128  }
   0x9   :  { %96 = vsyncadd [#allocation4], 4294967168 }
   0xa   :  { %41 = vsyncpa [#allocation3], 1 }
   0xb   :  { %42 = vsyncpa [#allocation4], 1 }

</bundles_post_ra>
